<compile_context>
chip_gen: v5e
topology: v5e:2x2
jax: 0.10.0
libtpu: 0.0.40
codegen_flags: <defaults>
</compile_context>

<pallas_src>
import functools

import jax
import jax.numpy as jnp
from jax.experimental import pallas as pl
from jax.experimental.pallas import tpu as pltpu


def _round_up(n, m):
    return ((n + m - 1) // m) * m


def policy_kernel(x_ref, w1_ref, b1_ref, w2_ref, b2_ref, o_ref):
    state_dim = x_ref.shape[1]
    x = x_ref[...]                                        # (bm, state_dim) f32

    # fc1: contraction dim is tiny -> unrolled VPU broadcast-FMAs (MXU stays free).
    h = x[:, 0:1] * w1_ref[0:1, :]
    for k in range(1, state_dim):                         # static unroll
        h = h + x[:, k:k + 1] * w1_ref[k:k + 1, :]
    h = jnp.maximum(h + b1_ref[...], 0.0)                 # (bm, HP) f32, ReLU

    # fc2: lane-dense (HP x AP) contraction on the MXU, f32 accumulation.
    # Operands are cast to the MXU dtype (bf16 by default); bias stays f32.
    logits = jnp.dot(h.astype(w2_ref.dtype), w2_ref[...],
                     preferred_element_type=jnp.float32) + b2_ref[...]

    # softmax over the last axis; padded action columns have bias -1e30 (f32)
    # so exp() underflows to exactly 0 and does not perturb the real columns.
    m = jnp.max(logits, axis=-1, keepdims=True)
    e = jnp.exp(logits - m)
    denom = jnp.sum(e, axis=-1, keepdims=True)
    # EXACT reciprocal: removes the systematic ~1e-3 bias of the approx EUP
    # path (probs must sum to 1 for REINFORCE log-prob gradients); still free
    # because the kernel is not VALU/EUP bound.
    inv = pl.reciprocal(denom, approx=False)
    o_ref[...] = (e * inv).astype(o_ref.dtype)            # lane-dense 128-wide store


@functools.partial(jax.jit, static_argnames=("block_m", "mxu_dtype"))
def policy_forward(x, w1, b1, w2, b2, *, block_m=2048, mxu_dtype=jnp.bfloat16):
    """probs = softmax(relu(x @ w1 + b1) @ w2 + b2, axis=1) via one Pallas kernel."""
    batch, state_dim = x.shape
    hidden = w1.shape[1]
    action_dim = w2.shape[1]

    HP = _round_up(max(hidden, 128), 128)        # lane-dense hidden width
    AP = _round_up(max(action_dim, 128), 128)    # lane-dense output width

    # Batch tiling:
    #   * bm is a multiple of 8 (sublane constraint)
    #   * bm <= ceil(rows/2) so batches > 8 rows give >= 2 grid steps
    #     (lets "parallel" shard across v7x's two TensorCores)
    #   * bm <= 8192 so live VMEM (double-buffered out + f32 intermediates,
    #     ~3 KiB/row) stays well under the 32 MiB default scoped limit / the
    #     64 MiB v7x physical VMEM.  Raise vmem_limit_bytes if this cap is lifted.
    rows8 = _round_up(batch, 8)
    half_rows = _round_up(pl.cdiv(rows8, 2), 8)
    bm = max(8, min(_round_up(block_m, 8), half_rows, 8192))
    padded_batch = _round_up(batch, bm)
    grid = (padded_batch // bm,)

    f32 = jnp.float32
    xp = jnp.pad(x.astype(f32), ((0, padded_batch - batch), (0, 0)))
    w1p = jnp.pad(w1.astype(f32), ((0, 0), (0, HP - hidden)))
    b1p = jnp.pad(b1.reshape(1, -1).astype(f32), ((0, 0), (0, HP - hidden)))
    # fc2 weights in the MXU dtype (bf16 default: 2x MXU rate on v6e/v7x,
    # half the resident bytes); f32 accumulation keeps the logits accurate.
    w2p = jnp.pad(w2.astype(f32), ((0, HP - hidden), (0, AP - action_dim))).astype(mxu_dtype)
    # -1e30 pad must stay f32 so padded-column exps are exactly 0.
    b2p = jnp.pad(b2.reshape(1, -1).astype(f32), ((0, 0), (0, AP - action_dim)),
                  constant_values=-1e30)

    itemsize = jnp.dtype(mxu_dtype).itemsize
    cost = pl.CostEstimate(
        flops=2 * padded_batch * (state_dim * HP + HP * AP),
        transcendentals=padded_batch * (AP + 1),
        bytes_accessed=(xp.size + padded_batch * AP) * 4
        + (w1p.size + b1p.size + b2p.size) * 4 + w2p.size * itemsize,
    )

    out = pl.pallas_call(
        policy_kernel,
        out_shape=jax.ShapeDtypeStruct((padded_batch, AP), jnp.float32),
        grid=grid,
        in_specs=[
            pl.BlockSpec((bm, state_dim), lambda i: (i, 0)),   # x tile per grid step
            pl.BlockSpec((state_dim, HP), lambda i: (0, 0)),   # weights resident
            pl.BlockSpec((1, HP), lambda i: (0, 0)),
            pl.BlockSpec((HP, AP), lambda i: (0, 0)),
            pl.BlockSpec((1, AP), lambda i: (0, 0)),
        ],
        out_specs=pl.BlockSpec((bm, AP), lambda i: (i, 0)),
        compiler_params=pltpu.CompilerParams(
            # batch grid is embarrassingly parallel -> megacore sharding on v7x.
            dimension_semantics=("parallel",),
        ),
        cost_estimate=cost,
    )(xp, w1p, b1p, w2p, b2p)

    # strip batch padding and the lane padding of the action dimension.
    return out[:batch, :action_dim]


def init_params(key, state_dim, hidden_dim, action_dim):
    # Mimics torch.nn.Linear default init: U(-1/sqrt(fan_in), 1/sqrt(fan_in)).
    # Weights are stored transposed vs PyTorch: W1 [state, hidden], W2 [hidden, action].
    k1, k2, k3, k4 = jax.random.split(key, 4)
    bound1 = 1.0 / jnp.sqrt(state_dim)
    bound2 = 1.0 / jnp.sqrt(hidden_dim)
    w1 = jax.random.uniform(k1, (state_dim, hidden_dim), jnp.float32, -bound1, bound1)
    b1 = jax.random.uniform(k2, (hidden_dim,), jnp.float32, -bound1, bound1)
    w2 = jax.random.uniform(k3, (hidden_dim, action_dim), jnp.float32, -bound2, bound2)
    b2 = jax.random.uniform(k4, (action_dim,), jnp.float32, -bound2, bound2)
    return w1, b1, w2, b2


if __name__ == "__main__":
    state_dim, hidden_dim, action_dim = 4, 32, 2
    batch = 50  # not a multiple of 8 -> exercises both row padding and a 2-step grid

    key = jax.random.PRNGKey(0)
    kx, kp = jax.random.split(key)
    x = jax.random.normal(kx, (batch, state_dim), jnp.float32)
    w1, b1, w2, b2 = init_params(kp, state_dim, hidden_dim, action_dim)

    # default block_m=2048 collapses to bm=32 here via the ceil(rows/2) cap,
    # giving grid=(2,) -> multi-tile path exercised even at this small scale.
    probs = policy_forward(x, w1, b1, w2, b2)
    jax.block_until_ready(probs)
    assert probs.shape == (batch, action_dim)

    # Exact reciprocal -> rows sum to 1 to f32 precision.
    assert jnp.allclose(jnp.sum(probs, axis=1), 1.0, atol=1e-3), "probs do not sum to 1"

    # Reference matched to the kernel's bf16 MXU operands (f32 accumulation):
    h_ref = jnp.maximum(x @ w1 + b1, 0.0)
    logits_bf16 = jnp.dot(h_ref.astype(jnp.bfloat16), w2.astype(jnp.bfloat16),
                          preferred_element_type=jnp.float32) + b2
    ref_bf16 = jax.nn.softmax(logits_bf16, axis=1)
    assert jnp.allclose(probs, ref_bf16, atol=2e-3), "mismatch vs bf16-matched reference"

    # Pure-f32 PyTorch-equivalent reference; looser tolerance covers the bf16
    # rounding of the fc2 operands (the only remaining approximation).
    ref_f32 = jax.nn.softmax(h_ref @ w2 + b2, axis=1)
    assert jnp.allclose(probs, ref_f32, atol=5e-3), "mismatch vs f32 reference"

    print("KERNEL_OK")
</pallas_src>

<mosaic_0001>
module attributes {stable_mosaic.version = 11 : i64} {
  func.func @policy_kernel(%arg0: i32, %arg1: memref<32x4xf32, #tpu.memory_space<vmem>>, %arg2: memref<4x128xf32, #tpu.memory_space<vmem>>, %arg3: memref<1x128xf32, #tpu.memory_space<vmem>>, %arg4: memref<128x128xbf16, #tpu.memory_space<vmem>>, %arg5: memref<1x128xf32, #tpu.memory_space<vmem>>, %arg6: memref<32x128xf32, #tpu.memory_space<vmem>>) attributes {dimension_semantics = [#tpu.dimension_semantics<parallel>], iteration_bounds = array<i64: 2>, scalar_prefetch = 0 : i64, scratch_operands = 0 : i64, tpu.core_type = #tpu.core_type<tc>, window_params = [{transform_indices = @transform_0, window_bounds = array<i64: 32, 4>}, {pipeline_mode = #tpu.pipeline_mode<synchronous>, transform_indices = @transform_1, window_bounds = array<i64: 4, 128>}, {pipeline_mode = #tpu.pipeline_mode<synchronous>, transform_indices = @transform_2, window_bounds = array<i64: 1, 128>}, {pipeline_mode = #tpu.pipeline_mode<synchronous>, transform_indices = @transform_3, window_bounds = array<i64: 128, 128>}, {pipeline_mode = #tpu.pipeline_mode<synchronous>, transform_indices = @transform_4, window_bounds = array<i64: 1, 128>}, {transform_indices = @transform_5, window_bounds = array<i64: 32, 128>}]} {
    %c0 = arith.constant 0 : index
    %c0_0 = arith.constant 0 : index
    %0 = vector.load %arg1[%c0, %c0_0] : memref<32x4xf32, #tpu.memory_space<vmem>>, vector<32x4xf32>
    %1 = vector.extract_strided_slice %0 {offsets = [0, 0], sizes = [32, 1], strides = [1, 1]} : vector<32x4xf32> to vector<32x1xf32>
    %c0_1 = arith.constant 0 : index
    %c0_2 = arith.constant 0 : index
    %2 = vector.load %arg2[%c0_1, %c0_2] : memref<4x128xf32, #tpu.memory_space<vmem>>, vector<1x128xf32>
    %3 = vector.broadcast %1 : vector<32x1xf32> to vector<32x128xf32>
    %4 = vector.broadcast %2 : vector<1x128xf32> to vector<32x128xf32>
    %5 = arith.mulf %3, %4 : vector<32x128xf32>
    %6 = vector.extract_strided_slice %0 {offsets = [0, 1], sizes = [32, 1], strides = [1, 1]} : vector<32x4xf32> to vector<32x1xf32>
    %c1 = arith.constant 1 : index
    %c0_3 = arith.constant 0 : index
    %7 = vector.load %arg2[%c1, %c0_3] : memref<4x128xf32, #tpu.memory_space<vmem>>, vector<1x128xf32>
    %8 = vector.broadcast %6 : vector<32x1xf32> to vector<32x128xf32>
    %9 = vector.broadcast %7 : vector<1x128xf32> to vector<32x128xf32>
    %10 = arith.mulf %8, %9 : vector<32x128xf32>
    %11 = arith.addf %5, %10 : vector<32x128xf32>
    %12 = vector.extract_strided_slice %0 {offsets = [0, 2], sizes = [32, 1], strides = [1, 1]} : vector<32x4xf32> to vector<32x1xf32>
    %c2 = arith.constant 2 : index
    %c0_4 = arith.constant 0 : index
    %13 = vector.load %arg2[%c2, %c0_4] : memref<4x128xf32, #tpu.memory_space<vmem>>, vector<1x128xf32>
    %14 = vector.broadcast %12 : vector<32x1xf32> to vector<32x128xf32>
    %15 = vector.broadcast %13 : vector<1x128xf32> to vector<32x128xf32>
    %16 = arith.mulf %14, %15 : vector<32x128xf32>
    %17 = arith.addf %11, %16 : vector<32x128xf32>
    %18 = vector.extract_strided_slice %0 {offsets = [0, 3], sizes = [32, 1], strides = [1, 1]} : vector<32x4xf32> to vector<32x1xf32>
    %c3 = arith.constant 3 : index
    %c0_5 = arith.constant 0 : index
    %19 = vector.load %arg2[%c3, %c0_5] : memref<4x128xf32, #tpu.memory_space<vmem>>, vector<1x128xf32>
    %20 = vector.broadcast %18 : vector<32x1xf32> to vector<32x128xf32>
    %21 = vector.broadcast %19 : vector<1x128xf32> to vector<32x128xf32>
    %22 = arith.mulf %20, %21 : vector<32x128xf32>
    %23 = arith.addf %17, %22 : vector<32x128xf32>
    %c0_6 = arith.constant 0 : index
    %c0_7 = arith.constant 0 : index
    %24 = vector.load %arg3[%c0_6, %c0_7] : memref<1x128xf32, #tpu.memory_space<vmem>>, vector<1x128xf32>
    %25 = vector.broadcast %24 : vector<1x128xf32> to vector<32x128xf32>
    %26 = arith.addf %23, %25 : vector<32x128xf32>
    %cst = arith.constant 0.000000e+00 : f32
    %27 = vector.broadcast %cst : f32 to vector<32x128xf32>
    %28 = arith.maximumf %26, %27 : vector<32x128xf32>
    %29 = arith.truncf %28 : vector<32x128xf32> to vector<32x128xbf16>
    %c0_8 = arith.constant 0 : index
    %c0_9 = arith.constant 0 : index
    %30 = vector.load %arg4[%c0_8, %c0_9] : memref<128x128xbf16, #tpu.memory_space<vmem>>, vector<128x128xbf16>
    %cst_10 = arith.constant dense<0.000000e+00> : vector<32x128xf32>
    %31 = tpu.matmul %29, %30, %cst_10 {dimension_numbers = #tpu.dot_dimension_numbers<[1], [0], [0], [1], [0, 0, 1, 1], [], []>} : vector<32x128xbf16>, vector<128x128xbf16>, vector<32x128xf32> -> vector<32x128xf32>
    %c0_11 = arith.constant 0 : index
    %c0_12 = arith.constant 0 : index
    %32 = vector.load %arg5[%c0_11, %c0_12] : memref<1x128xf32, #tpu.memory_space<vmem>>, vector<1x128xf32>
    %33 = vector.broadcast %32 : vector<1x128xf32> to vector<32x128xf32>
    %34 = arith.addf %31, %33 : vector<32x128xf32>
    %cst_13 = arith.constant dense<0xFF800000> : vector<32xf32>
    %35 = vector.multi_reduction <maximumf>, %34, %cst_13 [1] : vector<32x128xf32> to vector<32xf32>
    %36 = vector.shape_cast %35 : vector<32xf32> to vector<32x1xf32>
    %37 = vector.broadcast %36 : vector<32x1xf32> to vector<32x128xf32>
    %38 = arith.subf %34, %37 : vector<32x128xf32>
    %39 = math.exp %38 : vector<32x128xf32>
    %cst_14 = arith.constant dense<0.000000e+00> : vector<32xf32>
    %40 = vector.multi_reduction <add>, %39, %cst_14 [1] : vector<32x128xf32> to vector<32xf32>
    %41 = vector.shape_cast %40 : vector<32xf32> to vector<32x1xf32>
    %42 = tpu.reciprocal %41 : vector<32x1xf32> -> vector<32x1xf32>
    %43 = vector.broadcast %42 : vector<32x1xf32> to vector<32x128xf32>
    %44 = arith.mulf %39, %43 : vector<32x128xf32>
    %c0_15 = arith.constant 0 : index
    %c0_16 = arith.constant 0 : index
    %45 = vector.load %arg6[%c0_15, %c0_16] : memref<32x128xf32, #tpu.memory_space<vmem>>, vector<32x128xf32>
    tpu.vector_store %arg6[%c0_15, %c0_16], %44 {strides = array<i32>} : memref<32x128xf32, #tpu.memory_space<vmem>>, vector<32x128xf32>,
    return
  }
  func.func @transform_0(%arg0: i32) -> (i32, i32) {
    %c0_i32 = arith.constant 0 : i32
    %c0_i32_0 = arith.constant 0 : i32
    return %arg0, %c0_i32 : i32, i32
  }
  func.func @transform_1(%arg0: i32) -> (i32, i32) {
    %c0_i32 = arith.constant 0 : i32
    %c0_i32_0 = arith.constant 0 : i32
    %c0_i32_1 = arith.constant 0 : i32
    return %c0_i32, %c0_i32_0 : i32, i32
  }
  func.func @transform_2(%arg0: i32) -> (i32, i32) {
    %c0_i32 = arith.constant 0 : i32
    %c0_i32_0 = arith.constant 0 : i32
    %c0_i32_1 = arith.constant 0 : i32
    return %c0_i32, %c0_i32_0 : i32, i32
  }
  func.func @transform_3(%arg0: i32) -> (i32, i32) {
    %c0_i32 = arith.constant 0 : i32
    %c0_i32_0 = arith.constant 0 : i32
    %c0_i32_1 = arith.constant 0 : i32
    return %c0_i32, %c0_i32_0 : i32, i32
  }
  func.func @transform_4(%arg0: i32) -> (i32, i32) {
    %c0_i32 = arith.constant 0 : i32
    %c0_i32_0 = arith.constant 0 : i32
    %c0_i32_1 = arith.constant 0 : i32
    return %c0_i32, %c0_i32_0 : i32, i32
  }
  func.func @transform_5(%arg0: i32) -> (i32, i32) {
    %c0_i32 = arith.constant 0 : i32
    %c0_i32_0 = arith.constant 0 : i32
    return %arg0, %c0_i32 : i32, i32
  }
}

</mosaic_0001>

<bundles_post_ra>
// kernel: policy_forward.1
= control target key start
LH: loop header
LB: loop body
LE: loop exit
PB: predicated region body
PF: predicated region fallthrough
CT: control target
= control target key end

     0   :  { %s730_s18 = smov 0   ;;  %s810_s0 = inlined_call_operand.vmem [shape: f32[64,4], index: 0, kind: input, shape index: {}]   ;;  %s811_s1 = inlined_call_operand.vmem [shape: f32[4,128], index: 1, kind: input, shape index: {}]   ;;  %s812_s2 = inlined_call_operand.vmem [shape: f32[1,128], index: 2, kind: input, shape index: {}]   ;;  %s813_s3 = inlined_call_operand.vmem [shape: bf16[128,128], index: 3, kind: input, shape index: {}]   ;;  %s814_s4 = inlined_call_operand.vmem [shape: f32[1,128], index: 4, kind: input, shape index: {}]   ;;  %s815_s5 = inlined_call_operand.vmem [shape: f32[64,128], index: 5, kind: output, shape index: {}]  }
   0x1 LB: > { %s585_s19 = sadd.s32 4294967295, %s694_s18   ;;  %p589_p0 = scmp.ge.s32.totalorder %s694_s18, 1  ;;  %s694_s18 = sphi %s730_s18, %s15_s18  }
   0x2   : > { %p188_p1 = scmp.lt.s32.totalorder %s694_s18, 3 }
   0x4   : > { %p189_p2 = pnand %p589_p0, %p188_p1 }
   0x5   : > { %s590_s20 = sshll.u32 (!%p189_p2), %s585_s19, 2 }
   0x6   : > { %192 = sbr.rel (%p189_p2) target bundleno = 581 (0x245), region = 40  ;;  %p217_p3 = scmp.lt.s32.totalorder (!%p189_p2), %s590_s20, 7 }
   0xb   : > { %v696_v0 = vmov 1   ;;  %v697_v1 = vmov 0   ;;  %s817_s20 = smov (!%p217_p3, %s590_s20), 7  ;;  %v698_v6 = vmov 2   ;;  %v699_v7 = vmov 3   ;;  %v635_v8 = vld [vmem:[%s813_s3 + $0x38] sm:$0xff] }
   0xc   : > { %657 = vset.pattern.permute.xlu1 %v696_v0  ;;  %656 = vset.pattern.permute.xlu0 %v697_v1  ;;  %s591_s21 = sshll.u32 %s817_s20, 3  ;;  %v634_v9 = vld [vmem:[%s813_s3 + $0x30] sm:$0xff]  ;;  %v633_v11 = vld [vmem:[%s813_s3 + $0x28] sm:$0xff]  ;;  %v632_v12 = vld [vmem:[%s813_s3 + $0x20] sm:$0xff] }
   0xd   : > { %658 = vset.pattern.permute.xlu2 %v697_v1  ;;  %s220_s24 = scalar_lea.vmem %s810_s0, %s591_s21  ;;  %418 = vmatpush.bf16.msra.mxu0 %v635_v8  ;;  %v631_v14 = vld [vmem:[%s813_s3 + $0x18] sm:$0xff]  ;;  %v630_v15 = vld [vmem:[%s813_s3 + $0x10] sm:$0xff]  ;;  %v629_v18 = vld [vmem:[%s813_s3 + $0x8] sm:$0xff]  ;;  %s799_s8 = scalar_lea.vmem %s815_s5, %s591_s21 }
   0xe   : > { %v228_v2 = vld [vmem:[%s220_s24] sm:$0xff]  ;;  %v230_v3 = vld [vmem:[%s220_s24 + $0x10] sm:$0xff]  ;;  %v229_v4 = vld [vmem:[%s220_s24 + $0x8] sm:$0xff]  ;;  %636 = vmatpush.bf16.msra.mxu1 %v635_v8 }
   0xf   : > { %260 = vperm.xlu1 %657, %v228_v2   ;;  %235 = vperm.xlu0 %656, %v228_v2   ;;  %v231_v5 = vld [vmem:[%s220_s24 + $0x18] sm:$0xff]  ;;  %v628_v20 = vld [vmem:[%s813_s3] sm:$0xff] }
  0x10   : > { %245 = vperm.xlu2 %658, %v230_v3   ;;  %v666_v26 = vld [vmem:[%s811_s1] ss:$0 sm:$0xff]  ;;  %v667_v27 = vld [vmem:[%s811_s1 + $0x1] ss:$0 sm:$0xff]  ;;  %v668_v30 = vld [vmem:[%s811_s1 + $0x2] ss:$0 sm:$0xff] }
  0x11   : > { %419 = vmatpush.bf16.msra.mxu0 %v634_v9  ;;  %v669_v32 = vld [vmem:[%s811_s1 + $0x3] ss:$0 sm:$0xff]  ;;  %v670_v47 = vld [vmem:[%s812_s2] ss:$0 sm:$0xff] }
  0x12   : > { %637 = vmatpush.bf16.msra.mxu1 %v634_v9 }
  0x15   : > { %420 = vmatpush.bf16.msra.mxu0 %v633_v11 }
  0x16   : > { %638 = vmatpush.bf16.msra.mxu1 %v633_v11  ;;  %v671_v11 = vld [vmem:[%s814_s4] ss:$0 sm:$0xff] }
  0x17   : > { %264 = vperm.xlu1 %657, %v229_v4   ;;  %240 = vperm.xlu0 %656, %v229_v4  }
  0x18   : > { %250 = vperm.xlu2 %658, %v231_v5  }
  0x19   : > { %421 = vmatpush.bf16.msra.mxu0 %v632_v12 }
  0x1a   : > { %639 = vmatpush.bf16.msra.mxu1 %v632_v12 }
  0x1d   : > { %422 = vmatpush.bf16.msra.mxu0 %v631_v14 }
  0x1e   : > { %640 = vmatpush.bf16.msra.mxu1 %v631_v14 }
  0x1f   : > { %272 = vperm.xlu1 %657, %v231_v5   ;;  %659 = vset.pattern.permute.xlu0 %v696_v0 }
  0x20   : > { %268 = vperm.xlu0 %659, %v230_v3   ;;  %660 = vset.pattern.permute.xlu2 %v698_v6 }
  0x21   : > { %286 = vperm.xlu2 %660, %v228_v2   ;;  %423 = vmatpush.bf16.msra.mxu0 %v630_v15 }
  0x22   : > { %641 = vmatpush.bf16.msra.mxu1 %v630_v15 }
  0x25   : > { %424 = vmatpush.bf16.msra.mxu0 %v629_v18 }
  0x26   : > { %642 = vmatpush.bf16.msra.mxu1 %v629_v18 }
  0x27   : > { %661 = vset.pattern.permute.xlu1 %v698_v6 }
  0x28   : > { %290 = vperm.xlu1 %661, %v229_v4   ;;  %662 = vset.pattern.permute.xlu0 %v698_v6 }
  0x29   : > { %298 = vperm.xlu0 %662, %v231_v5   ;;  %294 = vperm.xlu2 %660, %v230_v3  }
  0x2a   : > { %425 = vmatpush.bf16.msra.mxu0 %v628_v20  ;;  %643 = vmatpush.bf16.msra.mxu1 %v628_v20 }
  0x30   : > { %663 = vset.pattern.permute.xlu1 %v699_v7 }
  0x31   : > { %312 = vperm.xlu1 %663, %v228_v2   ;;  %664 = vset.pattern.permute.xlu2 %v699_v7 }
  0x32   : > { %316 = vperm.xlu2 %664, %v229_v4   ;;  %665 = vset.pattern.permute.xlu0 %v699_v7 }
  0x39   : > { %320 = vperm.xlu1 %663, %v230_v3  }
  0x3a   : > { %324 = vperm.xlu2 %664, %v231_v5  }
  0x6a   : > { %v246_v10 = vpop.permute.xlu2 %245 }
  0x6b   : > { %v256_v54 = vmul.f32 %v666_v26, %v246_v10 }
  0x72   : > { %v251_v13 = vpop.permute.xlu2 %250 }
  0x73   : > { %v257_v44 = vmul.f32 %v666_v26, %v251_v13 }
  0x7b   : > { %v287_v19 = vpop.permute.xlu2 %286 }
  0x7c   : > { %v302_v42 = vmul.f32 %v668_v30, %v287_v19 }
  0x81   : > { %v261_v16 = vpop.permute.xlu1 %260  ;;  %v236_v17 = vpop.permute.xlu0 %235 }
  0x82   : > { %v276_v35 = vmul.f32 %v667_v27, %v261_v16  ;;  %v254_v36 = vmul.f32 %v666_v26, %v236_v17 }
  0x83   : > { %v295_v23 = vpop.permute.xlu2 %294 }
  0x84   : > { %v280_v41 = vadd.f32 %v276_v35, %v254_v36  ;;  %v304_v61 = vmul.f32 %v668_v30, %v295_v23 }
  0x86   : > { %v306_v50 = vadd.f32 %v302_v42, %v280_v41 }
  0x89   : > { %v265_v21 = vpop.permute.xlu1 %264  ;;  %v241_v22 = vpop.permute.xlu0 %240 }
  0x8a   : > { %v277_v28 = vmul.f32 %v667_v27, %v265_v21  ;;  %v255_v29 = vmul.f32 %v666_v26, %v241_v22 }
  0x8c   : > { %v317_v31 = vpop.permute.xlu2 %316  ;;  %v281_v37 = vadd.f32 %v277_v28, %v255_v29 }
  0x8d   : > { %v329_v38 = vmul.f32 %v669_v32, %v317_v31 }
  0x91   : > { %v273_v24 = vpop.permute.xlu1 %272 }
  0x92   : > { %v269_v25 = vpop.permute.xlu0 %268  ;;  %v279_v43 = vmul.f32 %v667_v27, %v273_v24 }
  0x93   : > { %v278_v52 = vmul.f32 %v667_v27, %v269_v25 }
  0x94   : > { %v325_v48 = vpop.permute.xlu2 %324  ;;  %v283_v51 = vadd.f32 %v279_v43, %v257_v44 }
  0x95   : > { %v331_v56 = vmul.f32 %v669_v32, %v325_v48  ;;  %v282_v59 = vadd.f32 %v278_v52, %v256_v54 }
  0x97   : > { %v308_v2 = vadd.f32 %v304_v61, %v282_v59 }
  0x9a   : > { %v291_v33 = vpop.permute.xlu1 %290 }
  0x9b   : > { %v303_v34 = vmul.f32 %v668_v30, %v291_v33  ;;  %v299_v40 = vpop.permute.xlu0 %298 }
  0x9c   : > { %v305_v46 = vmul.f32 %v668_v30, %v299_v40 }
  0x9d   : > { %v307_v39 = vadd.f32 %v303_v34, %v281_v37 }
  0x9e   : > { %v309_v55 = vadd.f32 %v305_v46, %v283_v51 }
  0x9f   : > { %v333_v45 = vadd.f32 %v329_v38, %v307_v39 }
  0xa0   : > { %v335_v62 = vadd.f32 %v331_v56, %v309_v55 }
  0xa1   : > { %v341_v58 = vadd.f32 %v670_v47, %v333_v45 }
  0xa2   : > { %v343_v6 = vadd.f32 %v670_v47, %v335_v62 }
  0xa3   : > { %v313_v49 = vpop.permute.xlu1 %312  ;;  %v345_v0 = vmax.f32 %v341_v58, 0.0 }
  0xa4   : > { %v328_v53 = vmul.f32 %v669_v32, %v313_v49  ;;  %v347_v9 = vmax.f32 %v343_v6, 0.0 }
  0xa6   : > { %v332_v57 = vadd.f32 %v328_v53, %v306_v50 }
  0xa8   : > { %v340_v60 = vadd.f32 %v670_v47, %v332_v57 }
  0xaa   : > { %v344_v63 = vmax.f32 %v340_v60, 0.0 }
  0xab   : > { %v321_v1 = vpop.permute.xlu1 %320 }
  0xac   : > { %v330_v3 = vmul.f32 %v669_v32, %v321_v1  ;;  %v348_v4 = vpack.c.bf16 %v345_v0, %v344_v63 }
  0xae   : > { %v334_v5 = vadd.f32 %v330_v3, %v308_v2  ;;  %426 = vmatmul.bf16.vlgmr.msra.gmra.mxu0 %v348_v4 }
  0xb0   : > { %v342_v7 = vadd.f32 %v670_v47, %v334_v5 }
  0xb2   : > { %v346_v8 = vmax.f32 %v342_v7, 0.0 }
  0xb4   : > { %v349_v10 = vpack.c.bf16 %v347_v9, %v346_v8 }
  0xb6   : > { %431 = vmatmul.bf16.vlgmr.msra.gmra.mxu1 %v349_v10 }
 0x12b   : > { %v427_v12 = vpop.f32.mrf.mxu0 }
 0x12c   : > { %v428_v13 = vadd.f32 %v671_v11, %v427_v12 }
 0x12e   : > { %437 = vmax.xlane.f32.xlu0 %v428_v13 }
 0x133   : > { %v429_v14 = vpop.f32.mrf.mxu0  ;;  %v432_v15 = vpop.f32.mrf.mxu1 }
 0x134   : > { %v430_v16 = vadd.f32 %v671_v11, %v429_v14  ;;  %v433_v17 = vadd.f32 %v671_v11, %v432_v15 }
 0x136   : > { %439 = vmax.xlane.f32.xlu1 %v430_v16  ;;  %441 = vmax.xlane.f32.xlu2 %v433_v17 }
 0x13b   : > { %v434_v18 = vpop.f32.mrf.mxu1 }
 0x13c   : > { %v435_v19 = vadd.f32 %v671_v11, %v434_v18 }
 0x13e   : > { %443 = vmax.xlane.f32.xlu2 %v435_v19 }
 0x1a1   : > { %v438_v20 = vpop.xlane.xlu0 %437 }
 0x1a2   : > { %v445_v21 = vsub.f32 %v428_v13, %v438_v20 }
 0x1a4   : > { %v449_v22 = vmul.f32 1.442695, %v445_v21 }
 0x1a6   : > { %672 = vpow2.f32 %v449_v22 }
 0x1a9   : > { %v440_v23 = vpop.xlane.xlu1 %439  ;;  %v442_v24 = vpop.xlane.xlu2 %441 }
 0x1aa   : > { %v446_v25 = vsub.f32 %v430_v16, %v440_v23  ;;  %v447_v26 = vsub.f32 %v433_v17, %v442_v24 }
 0x1ac   : > { %v673_v27 = vpop.eup %672  ;;  %v451_v28 = vmul.f32 1.442695, %v446_v25  ;;  %v453_v29 = vmul.f32 1.442695, %v447_v26 }
 0x1ad   : > { %457 = vadd.xlane.f32.xlu0 %v673_v27 }
 0x1ae   : > { %674 = vpow2.f32 %v451_v28 }
 0x1af   : > { %676 = vpow2.f32 %v453_v29 }
 0x1b1   : > { %v444_v30 = vpop.xlane.xlu2 %443 }
 0x1b2   : > { %v448_v31 = vsub.f32 %v435_v19, %v444_v30 }
 0x1b4   : > { %v675_v32 = vpop.eup %674  ;;  %v455_v33 = vmul.f32 1.442695, %v448_v31 }
 0x1b5   : > { %v788_v34 = vpop.eup %676  ;;  %459 = vadd.xlane.f32.xlu1 %v675_v32 }
 0x1b6   : > { %678 = vpow2.f32 %v455_v33  ;;  %461 = vadd.xlane.f32.xlu2 %v788_v34 }
 0x1bc   : > { %v791_v35 = vpop.eup %678 }
 0x1bd   : > { %463 = vadd.xlane.f32.xlu0 %v791_v35 }
 0x220   : > { %v458_v36 = vpop.xlane.xlu0 %457 }
 0x221   : > { %680 = vrcp.f32 %v458_v36  ;;  %v476_v42 = vand.u32 2147483648, %v458_v36  ;;  %v474_v44 = vand.u32 2147483647, %v458_v36  ;;  %vm470_vm1 = vweird.f32 %v458_v36 }
 0x223   : > { %v477_v47 = vor.u32 1.1754944e-38, %v476_v42  ;;  %vm475_vm3 = vcmp.eq.f32.partialorder %v474_v44, 8.507059e+37 }
 0x227   : > { %v681_v37 = vpop.eup %680 }
 0x228   : > { %v466_v38 = vmul.f32 %v681_v37, %v458_v36  ;;  %v460_v39 = vpop.xlane.xlu1 %459  ;;  %vm471_vm0 = vweird.f32 %v681_v37 }
 0x229   : > { %682 = vrcp.f32 %v460_v39  ;;  %v462_v40 = vpop.xlane.xlu2 %461  ;;  %vm472_vm2 = vmor %vm470_vm1, %vm471_vm0  ;;  %v490_v56 = vand.u32 2147483648, %v460_v39  ;;  %v488_v59 = vand.u32 2147483647, %v460_v39  ;;  %vm484_vm6 = vweird.f32 %v460_v39 }
 0x22a   : > { %v467_v41 = vsub.f32 1.0, %v466_v38  ;;  %684 = vrcp.f32 %v462_v40  ;;  %v504_v60 = vand.u32 2147483648, %v462_v40  ;;  %v502_v62 = vand.u32 2147483647, %v462_v40 }
 0x22b   : > { %v491_v1 = vor.u32 1.1754944e-38, %v490_v56  ;;  %vm498_vm8 = vweird.f32 %v462_v40  ;;  %vm489_vm9 = vcmp.eq.f32.partialorder %v488_v59, 8.507059e+37 }
 0x22c   : > { %v468_v43 = vmul.f32 %v681_v37, %v467_v41  ;;  %v505_v4 = vor.u32 1.1754944e-38, %v504_v60  ;;  %vm503_vm11 = vcmp.eq.f32.partialorder %v502_v62, 8.507059e+37 }
 0x22e   : > { %v469_v45 = vadd.f32 %v681_v37, %v468_v43 }
 0x22f   : > { %v683_v46 = vpop.eup %682 }
 0x230   : > { %v685_v48 = vpop.eup %684  ;;  %v473_v49 = vsel %vm472_vm2, %v681_v37, %v469_v45  ;;  %v480_v50 = vmul.f32 %v683_v46, %v460_v39  ;;  %v464_v51 = vpop.xlane.xlu0 %463  ;;  %vm485_vm4 = vweird.f32 %v683_v46 }
 0x231   : > { %v478_v52 = vsel %vm475_vm3, %v477_v47, %v473_v49  ;;  %v494_v53 = vmul.f32 %v685_v48, %v462_v40  ;;  %686 = vrcp.f32 %v464_v51  ;;  %vm499_vm5 = vweird.f32 %v685_v48  ;;  %vm486_vm7 = vmor %vm484_vm6, %vm485_vm4 }
 0x232   : > { %v521_v54 = vmul.f32 %v673_v27, %v478_v52  ;;  %v481_v55 = vsub.f32 1.0, %v480_v50  ;;  %vm500_vm10 = vmor %vm498_vm8, %vm499_vm5  ;;  %v518_v12 = vand.u32 2147483648, %v464_v51  ;;  %v516_v14 = vand.u32 2147483647, %v464_v51 }
 0x233   : > { %v495_v57 = vsub.f32 1.0, %v494_v53  ;;  %vm512_vm13 = vweird.f32 %v464_v51 }
 0x234   : > { %525 = vst [vmem:[%s799_s8] sm:$0xff] %v521_v54  ;;  %v482_v58 = vmul.f32 %v683_v46, %v481_v55  ;;  %v519_v16 = vor.u32 1.1754944e-38, %v518_v12  ;;  %vm517_vm15 = vcmp.eq.f32.partialorder %v516_v14, 8.507059e+37 }
 0x235   : > { %v496_v61 = vmul.f32 %v685_v48, %v495_v57 }
 0x236   : > { %v483_v63 = vadd.f32 %v683_v46, %v482_v58 }
 0x237   : > { %v687_v0 = vpop.eup %686  ;;  %v497_v2 = vadd.f32 %v685_v48, %v496_v61 }
 0x238   : > { %v487_v3 = vsel %vm486_vm7, %v683_v46, %v483_v63  ;;  %v508_v5 = vmul.f32 %v687_v0, %v464_v51  ;;  %vm513_vm12 = vweird.f32 %v687_v0 }
 0x239   : > { %v492_v6 = vsel %vm489_vm9, %v491_v1, %v487_v3  ;;  %v501_v7 = vsel %vm500_vm10, %v685_v48, %v497_v2  ;;  %vm514_vm14 = vmor %vm512_vm13, %vm513_vm12 }
 0x23a   : > { %v522_v8 = vmul.f32 %v675_v32, %v492_v6  ;;  %v506_v9 = vsel %vm503_vm11, %v505_v4, %v501_v7  ;;  %v509_v10 = vsub.f32 1.0, %v508_v5 }
 0x23b   : > { %v523_v11 = vmul.f32 %v788_v34, %v506_v9 }
 0x23c   : > { %526 = vst [vmem:[%s799_s8 + $0x8] sm:$0xff] %v522_v8  ;;  %v510_v13 = vmul.f32 %v687_v0, %v509_v10 }
 0x23d   : > { %527 = vst [vmem:[%s799_s8 + $0x10] sm:$0xff] %v523_v11 }
 0x23e   : > { %v511_v15 = vadd.f32 %v687_v0, %v510_v13 }
 0x240   : > { %v515_v17 = vsel %vm514_vm14, %v687_v0, %v511_v15 }
 0x241   : > { %v520_v18 = vsel %vm517_vm15, %v519_v16, %v515_v17 }
 0x242   : > { %v524_v19 = vmul.f32 %v791_v35, %v520_v18 }
 0x244   : > { %528 = vst [vmem:[%s799_s8 + $0x18] sm:$0xff] %v524_v19 }
 0x245 PF: > { %s15_s18 = sadd.s32 1, %s694_s18  }
 0x246   : > { %p12_p4 = scmp.ge.s32.totalorder %s15_s18, 4  }
 0x248   :  { %14 = sbr.rel (!%p12_p4) target bundleno = 1 (0x1), region = 70 }

</bundles_post_ra>
